<compile_context>
chip_gen: v6e
topology: v6e:2x2x1
jax: 0.10.0
libtpu: 0.0.40
codegen_flags: <defaults>
</compile_context>

<pallas_src>
import numpy as np
import jax
import jax.numpy as jnp
from jax import lax
from jax.experimental import pallas as pl
from jax.experimental.pallas import tpu as pltpu


# ----------------------------- Pallas kernels -------------------------------

def conv_stats_kernel(xg_ref, w_ref, out_ref, stats_ref):
    # xg_ref:    (TN, Kp)   bf16 gathered+masked neighbor features (zero-padded to Kp)
    # w_ref:     (Kp, Cout) bf16 flattened transposed-conv weight (zero-padded rows)
    # out_ref:   (TN, Cout) f32 conv output tile
    # stats_ref: (2, Cout)  f32 per-tile partial [sum; sum-of-squares]
    y = jnp.dot(xg_ref[...], w_ref[...], preferred_element_type=jnp.float32)
    out_ref[...] = y
    stats_ref[0:1, :] = jnp.sum(y, axis=0, keepdims=True)
    stats_ref[1:2, :] = jnp.sum(y * y, axis=0, keepdims=True)


def bn_relu_kernel(y_ref, scale_ref, shift_ref, o_ref):
    # Lane-dense slab: y_ref (TB, 128) f32; scale/shift (1, 128) broadcast.
    o_ref[...] = jnp.maximum(y_ref[...] * scale_ref[...] + shift_ref[...], 0.0)


# ------------------------------- wrapper -------------------------------------

def sparse_deconv_bn_relu(feats, nbr_idx, weight, gamma, beta, eps=1e-5, tn=512):
    N, Cin = feats.shape
    K3 = nbr_idx.shape[1]
    Cout = weight.shape[-1]
    assert 128 % Cout == 0  # TODO(synk): non-divisor Cout needs a non-slab BN fallback

    n_tiles = (N + tn - 1) // tn
    n_pad = n_tiles * tn

    # ---- neighbor gather (XLA glue; bf16-compressed — see module TODO above) ----
    mask = nbr_idx >= 0                                            # (N, K3)
    safe = jnp.where(mask, nbr_idx, 0)
    xg = feats.astype(jnp.bfloat16)[safe]                          # (N, K3, Cin) bf16
    xg = jnp.where(mask[..., None], xg, 0).reshape(N, K3 * Cin)

    kc = K3 * Cin
    kp = ((kc + 127) // 128) * 128                                 # lane-pad contraction
    xg = jnp.pad(xg, ((0, n_pad - N), (0, kp - kc)))               # (n_pad, kp) bf16
    w_flat = jnp.pad(weight.reshape(kc, Cout).astype(jnp.bfloat16),
                     ((0, kp - kc), (0, 0)))                       # (kp, Cout) bf16

    # ---- conv matmul + per-tile batch-stat partials (one pass over xg) ----
    conv_out, stats = pl.pallas_call(
        conv_stats_kernel,
        out_shape=(jax.ShapeDtypeStruct((n_pad, Cout), jnp.float32),
                   jax.ShapeDtypeStruct((n_tiles, 2, Cout), jnp.float32)),
        grid_spec=pltpu.PrefetchScalarGridSpec(
            num_scalar_prefetch=0,
            grid=(n_tiles,),
            in_specs=[pl.BlockSpec((tn, kp), lambda i: (i, 0)),
                      pl.BlockSpec((kp, Cout), lambda i: (0, 0))],   # resident weight
            out_specs=[pl.BlockSpec((tn, Cout), lambda i: (i, 0)),
                       pl.BlockSpec((None, 2, Cout), lambda i: (i, 0, 0))]),
        compiler_params=pltpu.CompilerParams(
            dimension_semantics=("parallel",)),   # per-tile partials -> megacore-safe
    )(xg, w_flat)

    # ---- BatchNorm finalize (training-mode batch stats, biased variance) ----
    # Padded rows are exactly zero (all-masked neighbors), so divide by the true N.
    tot = jnp.sum(stats, axis=0)                                   # (2, Cout) f32
    mean = tot[0] / N
    var = jnp.maximum(tot[1] / N - mean * mean, 0.0)               # guard cancellation
    # TODO(synk): for very large N / activation magnitudes use Welford / two-pass var.
    invstd = lax.rsqrt(var + eps)
    scale = gamma * invstd
    shift = beta - mean * scale

    # ---- fused BN + ReLU on a lane-dense (n_pad*Cout/128, 128) slab ----
    rep = 128 // Cout
    m = (n_pad * Cout) // 128
    slab = conv_out.reshape(m, 128)                                # free (metadata) reshape
    scale_s = jnp.tile(scale, rep).reshape(1, 128)
    shift_s = jnp.tile(shift, rep).reshape(1, 128)

    tb = m
    for cand in (1024, 512, 256, 128, 64, 32, 16, 8):
        if m % cand == 0:
            tb = cand
            break

    out = pl.pallas_call(
        bn_relu_kernel,
        out_shape=jax.ShapeDtypeStruct((m, 128), jnp.float32),
        grid_spec=pltpu.PrefetchScalarGridSpec(
            num_scalar_prefetch=0,
            grid=(m // tb,),
            in_specs=[pl.BlockSpec((tb, 128), lambda i: (i, 0)),
                      pl.BlockSpec((1, 128), lambda i: (0, 0)),
                      pl.BlockSpec((1, 128), lambda i: (0, 0))],
            out_specs=pl.BlockSpec((tb, 128), lambda i: (i, 0))),
        compiler_params=pltpu.CompilerParams(
            dimension_semantics=("parallel",)),
    )(slab, scale_s, shift_s)

    return out.reshape(n_pad, Cout)[:N]


# ------------------------- sparse kernel-map (glue) ---------------------------

def build_kernel_map(coords, ks, dilation=1, stride=1, transposed=True):
    """For a stride=1 (transposed) torchsparse conv, output coords == input coords.
    Returns (N, ks^3) int32 neighbor indices into the input point list (-1 = no
    neighbor).  Transposed conv uses the negated kernel offsets."""
    assert stride == 1  # TODO(synk): strided transposed-conv coordinate upsampling not implemented
    N = coords.shape[0]
    table = {tuple(c): i for i, c in enumerate(coords.tolist())}
    r = ks // 2
    sign = -1 if transposed else 1
    offsets = [(dx, dy, dz)
               for dx in range(-r, r + 1)
               for dy in range(-r, r + 1)
               for dz in range(-r, r + 1)]
    nbr = np.full((N, len(offsets)), -1, dtype=np.int32)
    for n in range(N):
        b, x, y, z = (int(v) for v in coords[n])
        for k, (dx, dy, dz) in enumerate(offsets):
            j = table.get((b, x + sign * dx * dilation,
                           y + sign * dy * dilation,
                           z + sign * dz * dilation))
            if j is not None:
                nbr[n, k] = j
    return nbr


# ---------------------------------- main --------------------------------------

if __name__ == "__main__":
    N, Cin, Cout, ks = 1000, 4, 16, 3
    key = jax.random.PRNGKey(0)
    k1, k2, k3, k4 = jax.random.split(key, 4)

    # Deterministic sparse voxel coordinates: batch=2, 12^3 grid, N unique points.
    rng = np.random.default_rng(0)
    coord_set = set()
    while len(coord_set) < N:
        b = int(rng.integers(0, 2))
        x, y, z = (int(v) for v in rng.integers(0, 12, size=3))
        coord_set.add((b, x, y, z))
    coords = np.array(sorted(coord_set), dtype=np.int32)            # (N, 4)

    feats = jax.random.normal(k1, (N, Cin), dtype=jnp.float32)      # sparse features (N, C)

    # spnn.Conv3d(transposed=True) weight: (ks^3, Cin, Cout), kaiming-style uniform init.
    K3 = ks ** 3
    bound = float((1.0 / (K3 * Cin)) ** 0.5)
    weight = jax.random.uniform(k2, (K3, Cin, Cout), minval=-bound, maxval=bound,
                                dtype=jnp.float32)
    # spnn.BatchNorm affine params (perturbed so the affine path is exercised).
    gamma = 1.0 + 0.1 * jax.random.normal(k3, (Cout,), dtype=jnp.float32)
    beta = 0.1 * jax.random.normal(k4, (Cout,), dtype=jnp.float32)

    nbr = jnp.asarray(build_kernel_map(coords, ks, transposed=True))

    out = jax.block_until_ready(sparse_deconv_bn_relu(feats, nbr, weight, gamma, beta))

    # Pure-JAX reference (same bf16 input rounding, f32 accumulation) for correctness.
    mask = nbr >= 0
    safe = jnp.where(mask, nbr, 0)
    xg_ref = jnp.where(mask[..., None], feats.astype(jnp.bfloat16)[safe], 0)
    conv_ref = jnp.einsum('nkc,kcd->nd', xg_ref, weight.astype(jnp.bfloat16),
                          preferred_element_type=jnp.float32)
    mean = conv_ref.mean(axis=0)
    var = conv_ref.var(axis=0)
    ref = jnp.maximum((conv_ref - mean) * lax.rsqrt(var + 1e-5) * gamma + beta, 0.0)
    err = float(jnp.max(jnp.abs(out - ref)))
    assert jnp.allclose(out, ref, atol=2e-3, rtol=2e-3), err

    print("KERNEL_OK")
</pallas_src>

<mosaic_0001>
module attributes {stable_mosaic.version = 11 : i64} {
  func.func @conv_stats_kernel(%arg0: i32, %arg1: memref<512x128xbf16, #tpu.memory_space<vmem>>, %arg2: memref<128x16xbf16, #tpu.memory_space<vmem>>, %arg3: memref<512x16xf32, #tpu.memory_space<vmem>>, %arg4: memref<1x2x16xf32, #tpu.memory_space<vmem>>) attributes {dimension_semantics = [#tpu.dimension_semantics<parallel>], iteration_bounds = array<i64: 2>, scalar_prefetch = 0 : i64, scratch_operands = 0 : i64, tpu.core_type = #tpu.core_type<tc>, window_params = [{transform_indices = @transform_0, window_bounds = array<i64: 512, 128>}, {pipeline_mode = #tpu.pipeline_mode<synchronous>, transform_indices = @transform_1, window_bounds = array<i64: 128, 16>}, {transform_indices = @transform_2, window_bounds = array<i64: 512, 16>}, {transform_indices = @transform_3, window_bounds = array<i64: 1, 2, 16>}]} {
    %c0 = arith.constant 0 : index
    %c0_0 = arith.constant 0 : index
    %0 = vector.load %arg1[%c0, %c0_0] : memref<512x128xbf16, #tpu.memory_space<vmem>>, vector<512x128xbf16>
    %c0_1 = arith.constant 0 : index
    %c0_2 = arith.constant 0 : index
    %1 = vector.load %arg2[%c0_1, %c0_2] : memref<128x16xbf16, #tpu.memory_space<vmem>>, vector<128x16xbf16>
    %cst = arith.constant dense<0.000000e+00> : vector<512x16xf32>
    %2 = tpu.matmul %0, %1, %cst {dimension_numbers = #tpu.dot_dimension_numbers<[1], [0], [0], [1], [0, 0, 1, 1], [], []>} : vector<512x128xbf16>, vector<128x16xbf16>, vector<512x16xf32> -> vector<512x16xf32>
    %c0_3 = arith.constant 0 : index
    %c0_4 = arith.constant 0 : index
    %3 = vector.load %arg3[%c0_3, %c0_4] : memref<512x16xf32, #tpu.memory_space<vmem>>, vector<512x16xf32>
    tpu.vector_store %arg3[%c0_3, %c0_4], %2 {strides = array<i32>} : memref<512x16xf32, #tpu.memory_space<vmem>>, vector<512x16xf32>,
    %cst_5 = arith.constant dense<0.000000e+00> : vector<16xf32>
    %4 = vector.multi_reduction <add>, %2, %cst_5 [0] : vector<512x16xf32> to vector<16xf32>
    %5 = vector.shape_cast %4 : vector<16xf32> to vector<1x16xf32>
    %c0_6 = arith.constant 0 : index
    %c0_7 = arith.constant 0 : index
    %c0_8 = arith.constant 0 : index
    %6 = vector.load %arg4[%c0_6, %c0_7, %c0_8] : memref<1x2x16xf32, #tpu.memory_space<vmem>>, vector<1x1x16xf32>
    %7 = vector.shape_cast %6 : vector<1x1x16xf32> to vector<1x16xf32>
    %8 = vector.shape_cast %5 : vector<1x16xf32> to vector<1x1x16xf32>
    tpu.vector_store %arg4[%c0_6, %c0_7, %c0_8], %8 {strides = array<i32>} : memref<1x2x16xf32, #tpu.memory_space<vmem>>, vector<1x1x16xf32>,
    %9 = arith.mulf %2, %2 : vector<512x16xf32>
    %cst_9 = arith.constant dense<0.000000e+00> : vector<16xf32>
    %10 = vector.multi_reduction <add>, %9, %cst_9 [0] : vector<512x16xf32> to vector<16xf32>
    %11 = vector.shape_cast %10 : vector<16xf32> to vector<1x16xf32>
    %c0_10 = arith.constant 0 : index
    %c1 = arith.constant 1 : index
    %c0_11 = arith.constant 0 : index
    %12 = vector.load %arg4[%c0_10, %c1, %c0_11] : memref<1x2x16xf32, #tpu.memory_space<vmem>>, vector<1x1x16xf32>
    %13 = vector.shape_cast %12 : vector<1x1x16xf32> to vector<1x16xf32>
    %14 = vector.shape_cast %11 : vector<1x16xf32> to vector<1x1x16xf32>
    tpu.vector_store %arg4[%c0_10, %c1, %c0_11], %14 {strides = array<i32>} : memref<1x2x16xf32, #tpu.memory_space<vmem>>, vector<1x1x16xf32>,
    return
  }
  func.func @transform_0(%arg0: i32) -> (i32, i32) {
    %c0_i32 = arith.constant 0 : i32
    %c0_i32_0 = arith.constant 0 : i32
    return %arg0, %c0_i32 : i32, i32
  }
  func.func @transform_1(%arg0: i32) -> (i32, i32) {
    %c0_i32 = arith.constant 0 : i32
    %c0_i32_0 = arith.constant 0 : i32
    %c0_i32_1 = arith.constant 0 : i32
    return %c0_i32, %c0_i32_0 : i32, i32
  }
  func.func @transform_2(%arg0: i32) -> (i32, i32) {
    %c0_i32 = arith.constant 0 : i32
    %c0_i32_0 = arith.constant 0 : i32
    return %arg0, %c0_i32 : i32, i32
  }
  func.func @transform_3(%arg0: i32) -> (i32, i32, i32) {
    %c0_i32 = arith.constant 0 : i32
    %c0_i32_0 = arith.constant 0 : i32
    %c0_i32_1 = arith.constant 0 : i32
    return %arg0, %c0_i32, %c0_i32_0 : i32, i32, i32
  }
}

</mosaic_0001>

<bundles_post_ra>
// kernel: tpu_custom_call.1
= control target key start
LH: loop header
LB: loop body
LE: loop exit
PB: predicated region body
PF: predicated region fallthrough
CT: control target
= control target key end

     0   :  { %9 = vsyncpa [#allocation3], 0  ;;  %s2381_s0 = inlined_call_operand.hbm [shape: bf16[1024,128], index: 0, kind: input, shape index: {}]   ;;  %s2382_s1 = inlined_call_operand.vmem [shape: bf16[128,16], index: 1, kind: input, shape index: {}]   ;;  %s2383_s2 = inlined_call_operand.vmem [shape: f32[1024,16], index: 2, kind: output, shape index: {0}]   ;;  %s2384_s3 = inlined_call_operand.hbm [shape: f32[2,2,16], index: 3, kind: output, shape index: {1}]  }
   0x1   :  { %11 = vsyncpa [#allocation3 + $0x1], 0 }
   0x2   :  { %12 = vsyncpa [#allocation4], 0 }
   0x3   :  { %14 = vsyncpa [#allocation4 + $0x1], 0  ;;  %s1728_s12 = smov 0   ;;  %s1730_s13 = smov 0  }
   0x4   :  { %s1732_s14 = smov 0   ;;  %s1734_s15 = smov 0  }
   0x5 LB: > { %s1749_s16 = sadd.s32 4294967295, %s1702_s15   ;;  %s1330_s17 = sadd.s32 4294967294, %s1702_s15   ;;  %s1702_s15 = sphi %s1734_s15, %s2399_s15   ;;  %s1698_s14 = sphi %s1732_s14, %s2398_s14   ;;  %s1694_s13 = sphi %s1730_s13, %s2397_s13   ;;  %s1690_s12 = sphi %s1728_s12, %s2396_s12  }
   0x6   : > { %s1753_s18 = sadd.s32 1, %s1702_s15   ;;  %s27_s19 = sadd.s32 1, %s1698_s14 }
   0x7   : > { %s24_s20 = ssub.s32 %s1702_s15, %s1753_s18  ;;  %p34_p0 = scmp.ne.s32.totalorder %s1698_s14, %s1694_s13 }
   0x8   : > { %p25_p1 = scmp.eq.s32.totalorder %s24_s20, 0  ;;  %p35_p2 = scmp.eq.s32.totalorder %s1702_s15, 0 }
   0x9   : > { %p40_p3 = scmp.ne.s32.totalorder %s1694_s13, %s1690_s12  ;;  %p41_p4 = scmp.eq.s32.totalorder %s1749_s16, 0 }
   0xa   : > { %s1765_s21 = scalar_select %p25_p1, %s1698_s14, %s27_s19  }
   0xb   : > { %p1767_p5 = por %p35_p2, %p34_p0  ;;  %p1771_p6 = por %p41_p4, %p40_p3 }
   0xc   : > { %p111_p7 = scmp.eq.s32.totalorder %s1749_s16, 1  ;;  %p117_p8 = scmp.eq.s32.totalorder %s1330_s17, 1 }
   0xd   : > { %s2388_s23 = scalar_select %p1771_p6, 1, 0 }
   0xe   : > { %p1534_p10 = scmp.lt.s32.totalorder %s1702_s15, 2  ;;  %p1778_p11 = por %p111_p7, %p34_p0 }
   0xf   : > { %p1782_p12 = por %p117_p8, %p40_p3  ;;  %s140_s26 = sand.u32 1, %s1698_s14  }
  0x10   : > { %s2389_s24 = scalar_select %p1778_p11, 1, 0 }
  0x11   : > { %s2390_s25 = scalar_select %p1782_p12, 1, 0 }
  0x12   : > { %s1385_s27 = sshll.u32 %s1702_s15, 12  ;;  %s1333_s28 = sshll.u32 %s140_s26, 8 }
  0x13   : > { %s1791_s4 = scalar_lea.hbm %s2381_s0, %s1385_s27  ;;  %s144_s5 = scalar_lea.vmem [#allocation2], %s1333_s28 }
  0x14   : > { %s151_s6 = sshll.u32 %s144_s5, 4  ;;  %p1795_p13 = pnand %p1534_p10, %p1767_p5  ;;  %s1799_s6 = int_to_ptr.vmem [resolvable:$true] %s151_s6 }
  0x15   : > { %s1801_s8 = scalar_lea.sflag [#allocation3], %s140_s26  ;;  %s1610_s9 = scalar_lea.hbm %s1791_s4, 4096 }
  0x16   : > { %p1611_p0 = scmp.ne.s32.totalorder %s1791_s4, %s1610_s9  ;;  %p1612_p1 = pneg %p1795_p13 }
  0x17   : > { %s1615_s17 = scalar_lea.hbm %s2381_s0, 8192  ;;  %p1616_p4 = scmp.lt.s32.totalorder %s1791_s4, %s2381_s0 }
  0x18   : > { %p1613_p2 = pnand %p1612_p1, %p1611_p0  ;;  %p1617_p5 = scmp.lt.s32.totalorder %s1615_s17, %s1610_s9 }
  0x1a   : > { %p1614_p3 = pneg %p1613_p2  ;;  %p1618_p7 = por %p1617_p5, %p1616_p4 }
  0x1c   : > { %p1619_p8 = pnand %p1618_p7, %p1614_p3 }
  0x1e   : > { %1622 = shalt.err (!%p1619_p8)
}
  0x1f   : > { %s1623_s22 = scalar_lea.vmem %s1799_s6, 4096  ;;  %s1704_s26 = smov [#allocation2]  }
  0x20   : > { %p1624_p10 = scmp.ne.s32.totalorder %s1799_s6, %s1623_s22  ;;  %s1628_s27 = sshll.u32 %s1704_s26, 4  ;;  %s1629_s27 = int_to_ptr.vmem [resolvable:$false] %s1628_s27 }
  0x21   : > { %s1630_s28 = scalar_lea.vmem %s1629_s27, 8192  ;;  %p1631_p2 = scmp.lt.s32.totalorder %s1799_s6, %s1629_s27 }
  0x22   : > { %p1626_p9 = pnand %p1624_p10, %p1612_p1  ;;  %p1632_p12 = scmp.lt.s32.totalorder %s1630_s28, %s1623_s22 }
  0x24   : > { %p1627_p0 = pneg %p1626_p9  ;;  %p1633_p11 = por %p1632_p12, %p1631_p2 }
  0x26   : > { %p1634_p6 = pnand %p1633_p11, %p1627_p0 }
  0x28   : > { %1637 = shalt.err (!%p1634_p6)
}
  0x29   : > { %s1705_s29 = smov 64   ;;  %s1706_s30 = smov 4  }
  0x2a   : > { %1529 = dma.hbm_to_vmem [thread:$0]  (!%p1795_p13), %s1791_s4, 4096, %s1799_s6, %s1801_s8, %s1705_s29, %s1705_s29, %s1706_s30  }
  0x2b   : > { %p1336_p9 = scmp.ge.s32.totalorder %s1702_s15, 1  ;;  %p159_p1 = scmp.lt.s32.totalorder %s1702_s15, 3 }
  0x2d   : > { %p160_p3 = pnand %p1336_p9, %p159_p1 }
  0x2e   : > { %s1825_s5 = sand.u32 (!%p160_p3), 1, %s1694_s13   ;;  %p2392_p6 = scmp.ne.s32.totalorder (!%p160_p3), %s2388_s23, 0 }
  0x2f   : > { %163 = sbr.rel (%p160_p3) target bundleno = 439 (0x1b7), region = 28  ;;  %s1337_s9 = sshll.u32 (!%p160_p3), %s1825_s5, 8 }
  0x30   : > { %s166_s10 = scalar_lea.sflag (!%p160_p3), [#allocation3], %s1825_s5  ;;  %s1829_s11 = scalar_lea.vmem (!%p160_p3), [#allocation2], %s1337_s9 }
  0x34   : > { %1681 = dma.done.wait (%p2392_p6), %s166_s10, 4096  }
  0x35   : > { %1683 = vsyncadd (%p2392_p6), %s166_s10, 4294963200  ;;  %v1570_v0 = vld [vmem:[%s2382_s1 + $0x38] sm:$0xff]   ;;  %v1571_v1 = vld [vmem:[%s2382_s1 + $0x30] sm:$0xff]   ;;  %s1339_s4 = sshll.u32 %s1749_s16, 6  ;;  %vm814_vm0 = vcmask 130048   ;;  %vm1012_vm1 = vcmask 122880  }
  0x36   : > { %1426 = vmatprep.subr.bf16.mxu0 %v1570_v0  ;;  %1506 = vmatprep.subr.bf16.mxu1 %v1570_v0  ;;  %v1572_v2 = vld [vmem:[%s2382_s1 + $0x28] sm:$0xff]   ;;  %v1573_v3 = vld [vmem:[%s2382_s1 + $0x20] sm:$0xff]   ;;  %v1574_v5 = vld [vmem:[%s2382_s1 + $0x18] sm:$0xff]   ;;  %p199_p11 = scmp.lt.s32.totalorder %s1339_s4, 127  ;;  %s1382_s19 = sshll.u32 %s1749_s16, 5 }
  0x37   : > { %1427 = vmatpush3.bf16.msra.mxu0 %v1570_v0  ;;  %1514 = vmatpush3.bf16.msra.mxu1 %v1570_v0  ;;  %v1578_v4 = vld [vmem:[%s1829_s11] sm:$0xff]   ;;  %v1575_v6 = vld [vmem:[%s2382_s1 + $0x10] sm:$0xff]   ;;  %v1576_v7 = vld [vmem:[%s2382_s1 + $0x8] sm:$0xff]   ;;  %s1233_s27 = scalar_lea.hbm %s2384_s3, %s1382_s19  ;;  %s1218_s28 = scalar_lea.sflag [#allocation4], %s1825_s5 }
  0x38   : > { %1428 = vmatprep.subr.bf16.mxu0 %v1571_v1  ;;  %1507 = vmatprep.subr.bf16.mxu1 %v1571_v1  ;;  %v1577_v8 = vld [vmem:[%s2382_s1] sm:$0xff]   ;;  %v1579_v10 = vld [vmem:[%s1829_s11 + $0x8] sm:$0xff]   ;;  %v1580_v11 = vld [vmem:[%s1829_s11 + $0x10] sm:$0xff]   ;;  %s2401_s4 = smov (!%p199_p11, %s1339_s4), 127  ;;  %p2393_p13 = scmp.ne.s32.totalorder %s2389_s24, 0 }
  0x39   : > { %1442 = vmatprep.mubr.bf16.mxu0 %v1578_v4  ;;  %v1594_v9 = vld [vmem:[%s1829_s11 + $0x80] sm:$0xff]   ;;  %v1595_v12 = vld [vmem:[%s1829_s11 + $0x88] sm:$0xff]   ;;  %v1596_v13 = vld [vmem:[%s1829_s11 + $0x90] sm:$0xff]   ;;  %s1340_s6 = sshll.u32 %s2401_s4, 3  ;;  %s1707_s30 = smov [#allocation5]  }
  0x3a   : > { %1474 = vmatprep.mubr.bf16.mxu1 %v1594_v9  ;;  %v1581_v14 = vld [vmem:[%s1829_s11 + $0x18] sm:$0xff]   ;;  %v1582_v15 = vld [vmem:[%s1829_s11 + $0x20] sm:$0xff]   ;;  %v1583_v18 = vld [vmem:[%s1829_s11 + $0x28] sm:$0xff]   ;;  %s1895_s17 = scalar_lea.vmem %s2383_s2, %s1340_s6  ;;  %s1642_s16 = sshll.u32 %s1707_s30, 4  ;;  %s1643_s16 = int_to_ptr.vmem [resolvable:$false] %s1642_s16 }
  0x3b   : > { %1429 = vmatpush3.bf16.msra.mxu0 %v1571_v1  ;;  %1515 = vmatpush3.bf16.msra.mxu1 %v1571_v1  ;;  %v1597_v16 = vld [vmem:[%s1829_s11 + $0x98] sm:$0xff]   ;;  %v1598_v17 = vld [vmem:[%s1829_s11 + $0xa0] sm:$0xff]   ;;  %v1599_v19 = vld [vmem:[%s1829_s11 + $0xa8] sm:$0xff]   ;;  %s1644_s9 = scalar_lea.vmem %s1643_s16, 64 }
  0x3c   : > { %1430 = vmatprep.subr.bf16.mxu0 %v1572_v2  ;;  %1508 = vmatprep.subr.bf16.mxu1 %v1572_v2  ;;  %v1584_v20 = vld [vmem:[%s1829_s11 + $0x30] sm:$0xff]   ;;  %v1585_v22 = vld [vmem:[%s1829_s11 + $0x38] sm:$0xff]   ;;  %v1586_v24 = vld [vmem:[%s1829_s11 + $0x40] sm:$0xff]  }
  0x3d   : > { %v1600_v21 = vld [vmem:[%s1829_s11 + $0xb0] sm:$0xff]   ;;  %v1601_v23 = vld [vmem:[%s1829_s11 + $0xb8] sm:$0xff]   ;;  %v1602_v25 = vld [vmem:[%s1829_s11 + $0xc0] sm:$0xff]  }
  0x3e   : > { %v1587_v26 = vld [vmem:[%s1829_s11 + $0x48] sm:$0xff]   ;;  %v1588_v28 = vld [vmem:[%s1829_s11 + $0x50] sm:$0xff]   ;;  %v1589_v30 = vld [vmem:[%s1829_s11 + $0x58] sm:$0xff]  }
  0x3f   : > { %1431 = vmatpush3.bf16.msra.mxu0 %v1572_v2  ;;  %1516 = vmatpush3.bf16.msra.mxu1 %v1572_v2  ;;  %v1603_v27 = vld [vmem:[%s1829_s11 + $0xc8] sm:$0xff]   ;;  %v1604_v29 = vld [vmem:[%s1829_s11 + $0xd0] sm:$0xff]   ;;  %v1605_v31 = vld [vmem:[%s1829_s11 + $0xd8] sm:$0xff]  }
  0x40   : > { %1432 = vmatprep.subr.bf16.mxu0 %v1573_v3  ;;  %1509 = vmatprep.subr.bf16.mxu1 %v1573_v3  ;;  %v1590_v32 = vld [vmem:[%s1829_s11 + $0x60] sm:$0xff]   ;;  %v1591_v34 = vld [vmem:[%s1829_s11 + $0x68] sm:$0xff]   ;;  %v1592_v36 = vld [vmem:[%s1829_s11 + $0x70] sm:$0xff]  }
  0x41   : > { %v1606_v33 = vld [vmem:[%s1829_s11 + $0xe0] sm:$0xff]   ;;  %v1607_v35 = vld [vmem:[%s1829_s11 + $0xe8] sm:$0xff]   ;;  %v1608_v37 = vld [vmem:[%s1829_s11 + $0xf0] sm:$0xff]  }
  0x42   : > { %v1593_v38 = vld [vmem:[%s1829_s11 + $0x78] sm:$0xff]  }
  0x43   : > { %1433 = vmatpush3.bf16.msra.mxu0 %v1573_v3  ;;  %1517 = vmatpush3.bf16.msra.mxu1 %v1573_v3  ;;  %v1609_v39 = vld [vmem:[%s1829_s11 + $0xf8] sm:$0xff]   ;;  %s1338_s11 = sshll.u32 %s1825_s5, 1 }
  0x44   : > { %1434 = vmatprep.subr.bf16.mxu0 %v1574_v5  ;;  %1510 = vmatprep.subr.bf16.mxu1 %v1574_v5  ;;  %s196_s23 = scalar_lea.vmem [#allocation5], %s1338_s11 }
  0x45   : > { %s1235_s20 = sshll.u32 %s196_s23, 4  ;;  %s1236_s20 = int_to_ptr.vmem [resolvable:$true] %s1235_s20 }
  0x46   : > { %s1638_s29 = scalar_lea.vmem %s1236_s20, 32  ;;  %p1645_p7 = scmp.lt.s32.totalorder %s1236_s20, %s1643_s16 }
  0x47   : > { %1435 = vmatpush3.bf16.msra.mxu0 %v1574_v5  ;;  %1518 = vmatpush3.bf16.msra.mxu1 %v1574_v5  ;;  %p1639_p12 = scmp.ne.s32.totalorder %s1236_s20, %s1638_s29  ;;  %p1646_p8 = scmp.lt.s32.totalorder %s1644_s9, %s1638_s29 }
  0x48   : > { %1436 = vmatprep.subr.bf16.mxu0 %v1575_v6  ;;  %1511 = vmatprep.subr.bf16.mxu1 %v1575_v6 }
  0x49   : > { %p1640_p4 = pnand %p1639_p12, %p2393_p13  ;;  %p1647_p10 = por %p1646_p8, %p1645_p7 }
  0x4b   : > { %1437 = vmatpush3.bf16.msra.mxu0 %v1575_v6  ;;  %1519 = vmatpush3.bf16.msra.mxu1 %v1575_v6  ;;  %p1641_p5 = pneg %p1640_p4 }
  0x4c   : > { %1438 = vmatprep.subr.bf16.mxu0 %v1576_v7  ;;  %1512 = vmatprep.subr.bf16.mxu1 %v1576_v7 }
  0x4d   : > { %p1648_p0 = pnand %p1647_p10, %p1641_p5 }
  0x4f   : > { %1439 = vmatpush3.bf16.msra.mxu0 %v1576_v7  ;;  %1520 = vmatpush3.bf16.msra.mxu1 %v1576_v7 }
  0x50   : > { %1440 = vmatprep.subr.bf16.mxu0 %v1577_v8  ;;  %1513 = vmatprep.subr.bf16.mxu1 %v1577_v8 }
  0x53   : > { %1441 = vmatpush3.bf16.msra.mxu0 %v1577_v8  ;;  %1521 = vmatpush3.bf16.msra.mxu1 %v1577_v8 }
  0x56   : > { %1443 = vmatmul.mubr.bf16.vlgmr.msra.gmra.mxu0 %v1579_v10  ;;  %1475 = vmatmul.mubr.bf16.vlgmr.msra.gmra.mxu1 %v1595_v12 }
  0x57   : > { %1446 = vmatprep.mubr.bf16.mxu0 %v1580_v11  ;;  %1478 = vmatprep.mubr.bf16.mxu1 %v1596_v13 }
  0x5e   : > { %1447 = vmatmul.mubr.bf16.gmra.mxu0 %v1581_v14  ;;  %1479 = vmatmul.mubr.bf16.gmra.mxu1 %v1597_v16 }
  0x5f   : > { %1450 = vmatprep.mubr.bf16.mxu0 %v1582_v15  ;;  %1482 = vmatprep.mubr.bf16.mxu1 %v1598_v17 }
  0x66   : > { %1451 = vmatmul.mubr.bf16.gmra.mxu0 %v1583_v18  ;;  %1483 = vmatmul.mubr.bf16.gmra.mxu1 %v1599_v19 }
  0x67   : > { %1454 = vmatprep.mubr.bf16.mxu0 %v1584_v20  ;;  %1486 = vmatprep.mubr.bf16.mxu1 %v1600_v21 }
  0x6e   : > { %1455 = vmatmul.mubr.bf16.gmra.mxu0 %v1585_v22  ;;  %1487 = vmatmul.mubr.bf16.gmra.mxu1 %v1601_v23 }
  0x6f   : > { %1458 = vmatprep.mubr.bf16.mxu0 %v1586_v24  ;;  %1490 = vmatprep.mubr.bf16.mxu1 %v1602_v25 }
  0x76   : > { %1459 = vmatmul.mubr.bf16.gmra.mxu0 %v1587_v26  ;;  %1491 = vmatmul.mubr.bf16.gmra.mxu1 %v1603_v27 }
  0x77   : > { %1462 = vmatprep.mubr.bf16.mxu0 %v1588_v28  ;;  %1494 = vmatprep.mubr.bf16.mxu1 %v1604_v29 }
  0x7e   : > { %1463 = vmatmul.mubr.bf16.gmra.mxu0 %v1589_v30  ;;  %1495 = vmatmul.mubr.bf16.gmra.mxu1 %v1605_v31 }
  0x7f   : > { %1466 = vmatprep.mubr.bf16.mxu0 %v1590_v32  ;;  %1498 = vmatprep.mubr.bf16.mxu1 %v1606_v33 }
  0x86   : > { %1467 = vmatmul.mubr.bf16.gmra.mxu0 %v1591_v34  ;;  %1499 = vmatmul.mubr.bf16.gmra.mxu1 %v1607_v35 }
  0x87   : > { %1470 = vmatprep.mubr.bf16.mxu0 %v1592_v36  ;;  %1502 = vmatprep.mubr.bf16.mxu1 %v1608_v37 }
  0x8e   : > { %1471 = vmatmul.mubr.bf16.gmra.mxu0 %v1593_v38  ;;  %1503 = vmatmul.mubr.bf16.gmra.mxu1 %v1609_v39 }
 0x116   : > { %v1444_v40 = vpop.f32.mrf.mxu0  ;;  %v1897_v41 = vpop.f32.mrf.mxu1 }
 0x117   : > { %817 = vst.msk [vmem:[%s1895_s17 + $0x10] sm:$0xff] %vm814_vm0, %v1444_v40  ;;  %849 = vst.msk [vmem:[%s1895_s17 + $0x110] sm:$0xff] %vm814_vm0, %v1897_v41  ;;  %v1016_v49 = vmul.f32 %v1444_v40, %v1444_v40  ;;  %v882_v56 = vsel %vm814_vm0, %v1444_v40, 0.0 }
 0x118   : > { %v559_v42 = vpop.f32.mrf.mxu0  ;;  %v1904_v43 = vpop.f32.mrf.mxu1 }
 0x119   : > { %815 = vst.msk [vmem:[%s1895_s17] sm:$0xff] %vm814_vm0, %v559_v42  ;;  %847 = vst.msk [vmem:[%s1895_s17 + $0x100] sm:$0xff] %vm814_vm0, %v1904_v43  ;;  %v1014_v46 = vmul.f32 %v559_v42, %v559_v42  ;;  %v879_v50 = vsel %vm814_vm0, %v559_v42, 0.0  ;;  %v1081_v0 = vsel %vm814_vm0, %v1016_v49, 0.0 }
 0x11a   : > { %v1445_v44 = vpop.f32.mrf.mxu0  ;;  %v1911_v45 = vpop.f32.mrf.mxu1 }
 0x11b   : > { %818 = vst.msk [vmem:[%s1895_s17 + $0x18] sm:$0xff] %vm814_vm0, %v1445_v44  ;;  %850 = vst.msk [vmem:[%s1895_s17 + $0x118] sm:$0xff] %vm814_vm0, %v1911_v45  ;;  %v1078_v57 = vsel %vm814_vm0, %v1014_v46, 0.0  ;;  %v1017_v58 = vmul.f32 %v1445_v44, %v1445_v44  ;;  %v884_v1 = vsel %vm814_vm0, %v1445_v44, 0.0 }
 0x11c   : > { %v562_v47 = vpop.f32.mrf.mxu0  ;;  %v1918_v48 = vpop.f32.mrf.mxu1 }
 0x11d   : > { %816 = vst.msk [vmem:[%s1895_s17 + $0x8] sm:$0xff] %vm814_vm0, %v562_v47  ;;  %v880_v51 = vsel %vm814_vm0, %v562_v47, 0.0  ;;  %v1015_v52 = vmul.f32 %v562_v47, %v562_v47  ;;  %848 = vst.msk [vmem:[%s1895_s17 + $0x108] sm:$0xff] %vm814_vm0, %v1918_v48  ;;  %v1083_v7 = vsel %vm814_vm0, %v1017_v58, 0.0 }
 0x11e   : > { %v881_v53 = vadd.f32 %v880_v51, %v879_v50  ;;  %v1448_v54 = vpop.f32.mrf.mxu0  ;;  %v1927_v55 = vpop.f32.mrf.mxu1 }
 0x11f   : > { %v1079_v59 = vsel %vm814_vm0, %v1015_v52, 0.0  ;;  %821 = vst.msk [vmem:[%s1895_s17 + $0x30] sm:$0xff] %vm814_vm0, %v1448_v54  ;;  %853 = vst.msk [vmem:[%s1895_s17 + $0x130] sm:$0xff] %vm814_vm0, %v1927_v55  ;;  %v1020_v13 = vmul.f32 %v1448_v54, %v1448_v54  ;;  %v890_v21 = vsel %vm814_vm0, %v1448_v54, 0.0 }
 0x120   : > { %v883_v60 = vadd.f32 %v882_v56, %v881_v53  ;;  %v1080_v61 = vadd.f32 %v1079_v59, %v1078_v57  ;;  %v575_v62 = vpop.f32.mrf.mxu0  ;;  %v1937_v63 = vpop.f32.mrf.mxu1 }
 0x121   : > { %819 = vst.msk [vmem:[%s1895_s17 + $0x20] sm:$0xff] %vm814_vm0, %v575_v62  ;;  %v1018_v2 = vmul.f32 %v575_v62, %v575_v62  ;;  %851 = vst.msk [vmem:[%s1895_s17 + $0x120] sm:$0xff] %vm814_vm0, %v1937_v63  ;;  %v886_v8 = vsel %vm814_vm0, %v575_v62, 0.0  ;;  %v1089_v28 = vsel %vm814_vm0, %v1020_v13, 0.0 }
 0x122   : > { %v1082_v3 = vadd.f32 %v1081_v0, %v1080_v61  ;;  %v885_v4 = vadd.f32 %v884_v1, %v883_v60  ;;  %v1449_v5 = vpop.f32.mrf.mxu0  ;;  %v1946_v6 = vpop.f32.mrf.mxu1 }
 0x123   : > { %822 = vst.msk [vmem:[%s1895_s17 + $0x38] sm:$0xff] %vm814_vm0, %v1449_v5  ;;  %854 = vst.msk [vmem:[%s1895_s17 + $0x138] sm:$0xff] %vm814_vm0, %v1946_v6  ;;  %v1085_v14 = vsel %vm814_vm0, %v1018_v2, 0.0  ;;  %v1021_v22 = vmul.f32 %v1449_v5, %v1449_v5  ;;  %v892_v29 = vsel %vm814_vm0, %v1449_v5, 0.0 }
 0x124   : > { %v887_v9 = vadd.f32 %v886_v8, %v885_v4  ;;  %v1084_v10 = vadd.f32 %v1083_v7, %v1082_v3  ;;  %v578_v11 = vpop.f32.mrf.mxu0  ;;  %v1955_v12 = vpop.f32.mrf.mxu1 }
 0x125   : > { %820 = vst.msk [vmem:[%s1895_s17 + $0x28] sm:$0xff] %vm814_vm0, %v578_v11  ;;  %v888_v15 = vsel %vm814_vm0, %v578_v11, 0.0  ;;  %v1019_v16 = vmul.f32 %v578_v11, %v578_v11  ;;  %852 = vst.msk [vmem:[%s1895_s17 + $0x128] sm:$0xff] %vm814_vm0, %v1955_v12  ;;  %v1091_v35 = vsel %vm814_vm0, %v1021_v22, 0.0 }
 0x126   : > { %v1086_v17 = vadd.f32 %v1085_v14, %v1084_v10  ;;  %v889_v18 = vadd.f32 %v888_v15, %v887_v9  ;;  %v1452_v19 = vpop.f32.mrf.mxu0  ;;  %v1964_v20 = vpop.f32.mrf.mxu1 }
 0x127   : > { %v1087_v23 = vsel %vm814_vm0, %v1019_v16, 0.0  ;;  %825 = vst.msk [vmem:[%s1895_s17 + $0x50] sm:$0xff] %vm814_vm0, %v1452_v19  ;;  %857 = vst.msk [vmem:[%s1895_s17 + $0x150] sm:$0xff] %vm814_vm0, %v1964_v20  ;;  %v1024_v42 = vmul.f32 %v1452_v19, %v1452_v19  ;;  %v898_v53 = vsel %vm814_vm0, %v1452_v19, 0.0 }
 0x128   : > { %v891_v24 = vadd.f32 %v890_v21, %v889_v18  ;;  %v1088_v25 = vadd.f32 %v1087_v23, %v1086_v17  ;;  %v591_v26 = vpop.f32.mrf.mxu0  ;;  %v1973_v27 = vpop.f32.mrf.mxu1 }
 0x129   : > { %823 = vst.msk [vmem:[%s1895_s17 + $0x40] sm:$0xff] %vm814_vm0, %v591_v26  ;;  %v1022_v30 = vmul.f32 %v591_v26, %v591_v26  ;;  %855 = vst.msk [vmem:[%s1895_s17 + $0x140] sm:$0xff] %vm814_vm0, %v1973_v27  ;;  %v894_v36 = vsel %vm814_vm0, %v591_v26, 0.0  ;;  %v1097_v61 = vsel %vm814_vm0, %v1024_v42, 0.0 }
 0x12a   : > { %v1090_v31 = vadd.f32 %v1089_v28, %v1088_v25  ;;  %v893_v32 = vadd.f32 %v892_v29, %v891_v24  ;;  %v1453_v33 = vpop.f32.mrf.mxu0  ;;  %v1982_v34 = vpop.f32.mrf.mxu1 }
 0x12b   : > { %826 = vst.msk [vmem:[%s1895_s17 + $0x58] sm:$0xff] %vm814_vm0, %v1453_v33  ;;  %858 = vst.msk [vmem:[%s1895_s17 + $0x158] sm:$0xff] %vm814_vm0, %v1982_v34  ;;  %v1093_v44 = vsel %vm814_vm0, %v1022_v30, 0.0  ;;  %v1025_v54 = vmul.f32 %v1453_v33, %v1453_v33  ;;  %v900_v62 = vsel %vm814_vm0, %v1453_v33, 0.0 }
 0x12c   : > { %v895_v37 = vadd.f32 %v894_v36, %v893_v32  ;;  %v1092_v38 = vadd.f32 %v1091_v35, %v1090_v31  ;;  %v594_v39 = vpop.f32.mrf.mxu0  ;;  %v1991_v40 = vpop.f32.mrf.mxu1 }
 0x12d   : > { %824 = vst.msk [vmem:[%s1895_s17 + $0x48] sm:$0xff] %vm814_vm0, %v594_v39  ;;  %v896_v46 = vsel %vm814_vm0, %v594_v39, 0.0  ;;  %v1023_v47 = vmul.f32 %v594_v39, %v594_v39  ;;  %856 = vst.msk [vmem:[%s1895_s17 + $0x148] sm:$0xff] %vm814_vm0, %v1991_v40  ;;  %v1099_v5 = vsel %vm814_vm0, %v1025_v54, 0.0 }
 0x12e   : > { %v1094_v49 = vadd.f32 %v1093_v44, %v1092_v38  ;;  %v897_v50 = vadd.f32 %v896_v46, %v895_v37  ;;  %v1456_v51 = vpop.f32.mrf.mxu0  ;;  %v2000_v52 = vpop.f32.mrf.mxu1 }
 0x12f   : > { %v1095_v56 = vsel %vm814_vm0, %v1023_v47, 0.0  ;;  %829 = vst.msk [vmem:[%s1895_s17 + $0x70] sm:$0xff] %vm814_vm0, %v1456_v51  ;;  %861 = vst.msk [vmem:[%s1895_s17 + $0x170] sm:$0xff] %vm814_vm0, %v2000_v52  ;;  %v1028_v13 = vmul.f32 %v1456_v51, %v1456_v51  ;;  %v906_v22 = vsel %vm814_vm0, %v1456_v51, 0.0 }
 0x130   : > { %v899_v57 = vadd.f32 %v898_v53, %v897_v50  ;;  %v1096_v58 = vadd.f32 %v1095_v56, %v1094_v49  ;;  %v607_v59 = vpop.f32.mrf.mxu0  ;;  %v2009_v60 = vpop.f32.mrf.mxu1 }
 0x131   : > { %827 = vst.msk [vmem:[%s1895_s17 + $0x60] sm:$0xff] %vm814_vm0, %v607_v59  ;;  %v1026_v0 = vmul.f32 %v607_v59, %v607_v59  ;;  %859 = vst.msk [vmem:[%s1895_s17 + $0x160] sm:$0xff] %vm814_vm0, %v2009_v60  ;;  %v902_v7 = vsel %vm814_vm0, %v607_v59, 0.0  ;;  %v1105_v30 = vsel %vm814_vm0, %v1028_v13, 0.0 }
 0x132   : > { %v1098_v1 = vadd.f32 %v1097_v61, %v1096_v58  ;;  %v901_v2 = vadd.f32 %v900_v62, %v899_v57  ;;  %v1457_v3 = vpop.f32.mrf.mxu0  ;;  %v2018_v4 = vpop.f32.mrf.mxu1 }
 0x133   : > { %830 = vst.msk [vmem:[%s1895_s17 + $0x78] sm:$0xff] %vm814_vm0, %v1457_v3  ;;  %862 = vst.msk [vmem:[%s1895_s17 + $0x178] sm:$0xff] %vm814_vm0, %v2018_v4  ;;  %v1101_v14 = vsel %vm814_vm0, %v1026_v0, 0.0  ;;  %v1029_v23 = vmul.f32 %v1457_v3, %v1457_v3  ;;  %v908_v31 = vsel %vm814_vm0, %v1457_v3, 0.0 }
 0x134   : > { %v903_v8 = vadd.f32 %v902_v7, %v901_v2  ;;  %v1100_v9 = vadd.f32 %v1099_v5, %v1098_v1  ;;  %v610_v10 = vpop.f32.mrf.mxu0  ;;  %v2027_v11 = vpop.f32.mrf.mxu1 }
 0x135   : > { %828 = vst.msk [vmem:[%s1895_s17 + $0x68] sm:$0xff] %vm814_vm0, %v610_v10  ;;  %v904_v15 = vsel %vm814_vm0, %v610_v10, 0.0  ;;  %v1027_v16 = vmul.f32 %v610_v10, %v610_v10  ;;  %860 = vst.msk [vmem:[%s1895_s17 + $0x168] sm:$0xff] %vm814_vm0, %v2027_v11  ;;  %v1107_v38 = vsel %vm814_vm0, %v1029_v23, 0.0 }
 0x136   : > { %v1102_v17 = vadd.f32 %v1101_v14, %v1100_v9  ;;  %v905_v18 = vadd.f32 %v904_v15, %v903_v8  ;;  %v1460_v19 = vpop.f32.mrf.mxu0  ;;  %v2036_v21 = vpop.f32.mrf.mxu1 }
 0x137   : > { %v1103_v24 = vsel %vm814_vm0, %v1027_v16, 0.0  ;;  %833 = vst.msk [vmem:[%s1895_s17 + $0x90] sm:$0xff] %vm814_vm0, %v1460_v19  ;;  %865 = vst.msk [vmem:[%s1895_s17 + $0x190] sm:$0xff] %vm814_vm0, %v2036_v21  ;;  %v1032_v49 = vmul.f32 %v1460_v19, %v1460_v19  ;;  %v914_v59 = vsel %vm814_vm0, %v1460_v19, 0.0 }
 0x138   : > { %v907_v25 = vadd.f32 %v906_v22, %v905_v18  ;;  %v1104_v26 = vadd.f32 %v1103_v24, %v1102_v17  ;;  %v623_v28 = vpop.f32.mrf.mxu0  ;;  %v2045_v29 = vpop.f32.mrf.mxu1 }
 0x139   : > { %831 = vst.msk [vmem:[%s1895_s17 + $0x80] sm:$0xff] %vm814_vm0, %v623_v28  ;;  %v1030_v32 = vmul.f32 %v623_v28, %v623_v28  ;;  %863 = vst.msk [vmem:[%s1895_s17 + $0x180] sm:$0xff] %vm814_vm0, %v2045_v29  ;;  %v910_v39 = vsel %vm814_vm0, %v623_v28, 0.0  ;;  %v1113_v5 = vsel %vm814_vm0, %v1032_v49, 0.0 }
 0x13a   : > { %v1106_v33 = vadd.f32 %v1105_v30, %v1104_v26  ;;  %v909_v35 = vadd.f32 %v908_v31, %v907_v25  ;;  %v1461_v36 = vpop.f32.mrf.mxu0  ;;  %v2054_v37 = vpop.f32.mrf.mxu1 }
 0x13b   : > { %834 = vst.msk [vmem:[%s1895_s17 + $0x98] sm:$0xff] %vm814_vm0, %v1461_v36  ;;  %866 = vst.msk [vmem:[%s1895_s17 + $0x198] sm:$0xff] %vm814_vm0, %v2054_v37  ;;  %v1109_v50 = vsel %vm814_vm0, %v1030_v32, 0.0  ;;  %v1033_v61 = vmul.f32 %v1461_v36, %v1461_v36  ;;  %v916_v7 = vsel %vm814_vm0, %v1461_v36, 0.0 }
 0x13c   : > { %v911_v42 = vadd.f32 %v910_v39, %v909_v35  ;;  %v1108_v44 = vadd.f32 %v1107_v38, %v1106_v33  ;;  %v626_v46 = vpop.f32.mrf.mxu0  ;;  %v2063_v47 = vpop.f32.mrf.mxu1 }
 0x13d   : > { %832 = vst.msk [vmem:[%s1895_s17 + $0x88] sm:$0xff] %vm814_vm0, %v626_v46  ;;  %v912_v51 = vsel %vm814_vm0, %v626_v46, 0.0  ;;  %v1031_v53 = vmul.f32 %v626_v46, %v626_v46  ;;  %864 = vst.msk [vmem:[%s1895_s17 + $0x188] sm:$0xff] %vm814_vm0, %v2063_v47  ;;  %v1115_v15 = vsel %vm814_vm0, %v1033_v61, 0.0 }
 0x13e   : > { %v1110_v54 = vadd.f32 %v1109_v50, %v1108_v44  ;;  %v913_v56 = vadd.f32 %v912_v51, %v911_v42  ;;  %v1464_v57 = vpop.f32.mrf.mxu0  ;;  %v2072_v58 = vpop.f32.mrf.mxu1 }
 0x13f   : > { %v1111_v62 = vsel %vm814_vm0, %v1031_v53, 0.0  ;;  %837 = vst.msk [vmem:[%s1895_s17 + $0xb0] sm:$0xff] %vm814_vm0, %v1464_v57  ;;  %869 = vst.msk [vmem:[%s1895_s17 + $0x1b0] sm:$0xff] %vm814_vm0, %v2072_v58  ;;  %v1036_v23 = vmul.f32 %v1464_v57, %v1464_v57  ;;  %v922_v33 = vsel %vm814_vm0, %v1464_v57, 0.0 }
 0x140   : > { %v915_v0 = vadd.f32 %v914_v59, %v913_v56  ;;  %v1112_v1 = vadd.f32 %v1111_v62, %v1110_v54  ;;  %v639_v2 = vpop.f32.mrf.mxu0  ;;  %v2081_v3 = vpop.f32.mrf.mxu1 }
 0x141   : > { %835 = vst.msk [vmem:[%s1895_s17 + $0xa0] sm:$0xff] %vm814_vm0, %v639_v2  ;;  %v1034_v8 = vmul.f32 %v639_v2, %v639_v2  ;;  %867 = vst.msk [vmem:[%s1895_s17 + $0x1a0] sm:$0xff] %vm814_vm0, %v2081_v3  ;;  %v918_v16 = vsel %vm814_vm0, %v639_v2, 0.0  ;;  %v1121_v46 = vsel %vm814_vm0, %v1036_v23, 0.0 }
 0x142   : > { %v1114_v9 = vadd.f32 %v1113_v5, %v1112_v1  ;;  %v917_v10 = vadd.f32 %v916_v7, %v915_v0  ;;  %v1465_v13 = vpop.f32.mrf.mxu0  ;;  %v2090_v14 = vpop.f32.mrf.mxu1 }
 0x143   : > { %838 = vst.msk [vmem:[%s1895_s17 + $0xb8] sm:$0xff] %vm814_vm0, %v1465_v13  ;;  %870 = vst.msk [vmem:[%s1895_s17 + $0x1b8] sm:$0xff] %vm814_vm0, %v2090_v14  ;;  %v1117_v24 = vsel %vm814_vm0, %v1034_v8, 0.0  ;;  %v1037_v35 = vmul.f32 %v1465_v13, %v1465_v13  ;;  %v924_v49 = vsel %vm814_vm0, %v1465_v13, 0.0 }
 0x144   : > { %v919_v17 = vadd.f32 %v918_v16, %v917_v10  ;;  %v1116_v18 = vadd.f32 %v1115_v15, %v1114_v9  ;;  %v642_v19 = vpop.f32.mrf.mxu0  ;;  %v2099_v22 = vpop.f32.mrf.mxu1 }
 0x145   : > { %836 = vst.msk [vmem:[%s1895_s17 + $0xa8] sm:$0xff] %vm814_vm0, %v642_v19  ;;  %v920_v25 = vsel %vm814_vm0, %v642_v19, 0.0  ;;  %v1035_v26 = vmul.f32 %v642_v19, %v642_v19  ;;  %868 = vst.msk [vmem:[%s1895_s17 + $0x1a8] sm:$0xff] %vm814_vm0, %v2099_v22  ;;  %v1123_v57 = vsel %vm814_vm0, %v1037_v35, 0.0 }
 0x146   : > { %v1118_v28 = vadd.f32 %v1117_v24, %v1116_v18  ;;  %v921_v30 = vadd.f32 %v920_v25, %v919_v17  ;;  %v1468_v31 = vpop.f32.mrf.mxu0  ;;  %v2108_v32 = vpop.f32.mrf.mxu1 }
 0x147   : > { %v1119_v36 = vsel %vm814_vm0, %v1035_v26, 0.0  ;;  %841 = vst.msk [vmem:[%s1895_s17 + $0xd0] sm:$0xff] %vm814_vm0, %v1468_v31  ;;  %873 = vst.msk [vmem:[%s1895_s17 + $0x1d0] sm:$0xff] %vm814_vm0, %v2108_v32  ;;  %v1040_v2 = vmul.f32 %v1468_v31, %v1468_v31  ;;  %v930_v16 = vsel %vm814_vm0, %v1468_v31, 0.0 }
 0x148   : > { %v923_v38 = vadd.f32 %v922_v33, %v921_v30  ;;  %v1120_v39 = vadd.f32 %v1119_v36, %v1118_v28  ;;  %v655_v42 = vpop.f32.mrf.mxu0  ;;  %v2117_v44 = vpop.f32.mrf.mxu1 }
 0x149   : > { %839 = vst.msk [vmem:[%s1895_s17 + $0xc0] sm:$0xff] %vm814_vm0, %v655_v42  ;;  %v1038_v50 = vmul.f32 %v655_v42, %v655_v42  ;;  %871 = vst.msk [vmem:[%s1895_s17 + $0x1c0] sm:$0xff] %vm814_vm0, %v2117_v44  ;;  %v926_v59 = vsel %vm814_vm0, %v655_v42, 0.0  ;;  %v1129_v26 = vsel %vm814_vm0, %v1040_v2, 0.0 }
 0x14a   : > { %v1122_v51 = vadd.f32 %v1121_v46, %v1120_v39  ;;  %v925_v53 = vadd.f32 %v924_v49, %v923_v38  ;;  %v1469_v54 = vpop.f32.mrf.mxu0  ;;  %v2126_v56 = vpop.f32.mrf.mxu1 }
 0x14b   : > { %842 = vst.msk [vmem:[%s1895_s17 + $0xd8] sm:$0xff] %vm814_vm0, %v1469_v54  ;;  %874 = vst.msk [vmem:[%s1895_s17 + $0x1d8] sm:$0xff] %vm814_vm0, %v2126_v56  ;;  %v1125_v5 = vsel %vm814_vm0, %v1038_v50, 0.0  ;;  %v1041_v17 = vmul.f32 %v1469_v54, %v1469_v54  ;;  %v932_v28 = vsel %vm814_vm0, %v1469_v54, 0.0 }
 0x14c   : > { %v927_v61 = vadd.f32 %v926_v59, %v925_v53  ;;  %v1124_v62 = vadd.f32 %v1123_v57, %v1122_v51  ;;  %v658_v0 = vpop.f32.mrf.mxu0  ;;  %v2135_v1 = vpop.f32.mrf.mxu1 }
 0x14d   : > { %840 = vst.msk [vmem:[%s1895_s17 + $0xc8] sm:$0xff] %vm814_vm0, %v658_v0  ;;  %v928_v7 = vsel %vm814_vm0, %v658_v0, 0.0  ;;  %v1039_v8 = vmul.f32 %v658_v0, %v658_v0  ;;  %872 = vst.msk [vmem:[%s1895_s17 + $0x1c8] sm:$0xff] %vm814_vm0, %v2135_v1  ;;  %v1131_v38 = vsel %vm814_vm0, %v1041_v17, 0.0 }
 0x14e   : > { %v1126_v9 = vadd.f32 %v1125_v5, %v1124_v62  ;;  %v929_v10 = vadd.f32 %v928_v7, %v927_v61  ;;  %v1472_v13 = vpop.f32.mrf.mxu0  ;;  %v2144_v15 = vpop.f32.mrf.mxu1 }
 0x14f   : > { %v1127_v18 = vsel %vm814_vm0, %v1039_v8, 0.0  ;;  %845 = vst.msk [vmem:[%s1895_s17 + $0xf0] sm:$0xff] %vm814_vm0, %v1472_v13  ;;  %877 = vst.msk [vmem:[%s1895_s17 + $0x1f0] sm:$0xff] %vm814_vm0, %v2144_v15  ;;  %v1044_v51 = vmul.f32 %v1472_v13, %v1472_v13  ;;  %v938_v62 = vsel %vm814_vm0, %v1472_v13, 0.0  ;;  %v1047_v13 = vmul.f32 %v1918_v48, %v1918_v48 }
 0x150   : > { %v931_v19 = vadd.f32 %v930_v16, %v929_v10  ;;  %v1128_v23 = vadd.f32 %v1127_v18, %v1126_v9  ;;  %v671_v24 = vpop.f32.mrf.mxu0  ;;  %v2153_v25 = vpop.f32.mrf.mxu1  ;;  %v1046_v10 = vmul.f32 %v1904_v43, %v1904_v43 }
 0x151   : > { %843 = vst.msk [vmem:[%s1895_s17 + $0xe0] sm:$0xff] %vm814_vm0, %v671_v24  ;;  %v1042_v30 = vmul.f32 %v671_v24, %v671_v24  ;;  %875 = vst.msk [vmem:[%s1895_s17 + $0x1e0] sm:$0xff] %vm814_vm0, %v2153_v25  ;;  %v934_v39 = vsel %vm814_vm0, %v671_v24, 0.0  ;;  %v1137_v8 = vsel %vm814_vm0, %v1044_v51, 0.0 }
 0x152   : > { %v1130_v31 = vadd.f32 %v1129_v26, %v1128_v23  ;;  %v933_v33 = vadd.f32 %v932_v28, %v931_v19  ;;  %v1473_v35 = vpop.f32.mrf.mxu0  ;;  %v2162_v36 = vpop.f32.mrf.mxu1  ;;  %v942_v19 = vsel %vm814_vm0, %v1904_v43, 0.0  ;;  %v1048_v26 = vmul.f32 %v1897_v41, %v1897_v41 }
 0x153   : > { %846 = vst.msk [vmem:[%s1895_s17 + $0xf8] sm:$0xff] %vm814_vm0, %v1473_v35  ;;  %878 = vst.msk [vmem:[%s1895_s17 + $0x1f8] sm:$0xff] %vm814_vm0, %v2162_v36  ;;  %v1133_v53 = vsel %vm814_vm0, %v1042_v30, 0.0  ;;  %v1045_v0 = vmul.f32 %v1473_v35, %v1473_v35  ;;  %v940_v9 = vsel %vm814_vm0, %v1473_v35, 0.0  ;;  %v1141_v28 = vsel %vm814_vm0, %v1046_v10, 0.0 }
 0x154   : > { %v935_v42 = vadd.f32 %v934_v39, %v933_v33  ;;  %v1132_v46 = vadd.f32 %v1131_v38, %v1130_v31  ;;  %v674_v49 = vpop.f32.mrf.mxu0  ;;  %v2171_v50 = vpop.f32.mrf.mxu1  ;;  %v944_v30 = vsel %vm814_vm0, %v1918_v48, 0.0  ;;  %v946_v35 = vsel %vm814_vm0, %v1897_v41, 0.0 }
 0x155   : > { %844 = vst.msk [vmem:[%s1895_s17 + $0xe8] sm:$0xff] %vm814_vm0, %v674_v49  ;;  %v936_v54 = vsel %vm814_vm0, %v674_v49, 0.0  ;;  %v1043_v57 = vmul.f32 %v674_v49, %v674_v49  ;;  %876 = vst.msk [vmem:[%s1895_s17 + $0x1e8] sm:$0xff] %vm814_vm0, %v2171_v50  ;;  %v1139_v18 = vsel %vm814_vm0, %v1045_v0, 0.0  ;;  %v1049_v43 = vmul.f32 %v1911_v45, %v1911_v45 }
 0x156   : > { %v1134_v59 = vadd.f32 %v1133_v53, %v1132_v46  ;;  %v937_v61 = vadd.f32 %v936_v54, %v935_v42  ;;  %v1143_v38 = vsel %vm814_vm0, %v1047_v13, 0.0  ;;  %v1145_v46 = vsel %vm814_vm0, %v1048_v26, 0.0 }
 0x157   : > { %v1135_v2 = vsel %vm814_vm0, %v1043_v57, 0.0  ;;  %v948_v49 = vsel %vm814_vm0, %v1911_v45, 0.0  ;;  %v1050_v48 = vmul.f32 %v1937_v63, %v1937_v63  ;;  %v1147_v54 = vsel %vm814_vm0, %v1049_v43, 0.0 }
 0x158   : > { %v939_v5 = vadd.f32 %v938_v62, %v937_v61  ;;  %v1136_v7 = vadd.f32 %v1135_v2, %v1134_v59  ;;  %v950_v41 = vsel %vm814_vm0, %v1937_v63, 0.0  ;;  %v1051_v57 = vmul.f32 %v1955_v12, %v1955_v12 }
 0x159   : > { %v1052_v62 = vmul.f32 %v1927_v55, %v1927_v55  ;;  %v1149_v45 = vsel %vm814_vm0, %v1050_v48, 0.0  ;;  %v952_v0 = vsel %vm814_vm0, %v1955_v12, 0.0  ;;  %v1053_v63 = vmul.f32 %v1946_v6, %v1946_v6 }
 0x15a   : > { %v941_v16 = vadd.f32 %v940_v9, %v939_v5  ;;  %v1138_v17 = vadd.f32 %v1137_v8, %v1136_v7  ;;  %v954_v7 = vsel %vm814_vm0, %v1927_v55, 0.0  ;;  %v1151_v8 = vsel %vm814_vm0, %v1051_v57, 0.0 }
 0x15b   : > { %v1054_v12 = vmul.f32 %v1973_v27, %v1973_v27  ;;  %v1155_v13 = vsel %vm814_vm0, %v1053_v63, 0.0  ;;  %v958_v55 = vsel %vm814_vm0, %v1973_v27, 0.0  ;;  %v1057_v27 = vmul.f32 %v1982_v34, %v1982_v34 }
 0x15c   : > { %v1140_v23 = vadd.f32 %v1139_v18, %v1138_v17  ;;  %v943_v24 = vadd.f32 %v942_v19, %v941_v16  ;;  %v1153_v16 = vsel %vm814_vm0, %v1052_v62, 0.0  ;;  %v956_v17 = vsel %vm814_vm0, %v1946_v6, 0.0 }
 0x15d   : > { %v1157_v6 = vsel %vm814_vm0, %v1054_v12, 0.0  ;;  %v1060_v57 = vmul.f32 %v2000_v52, %v2000_v52  ;;  %v972_v63 = vsel %vm814_vm0, %v2018_v4, 0.0 }
 0x15e   : > { %v945_v31 = vadd.f32 %v944_v30, %v943_v24  ;;  %v1142_v33 = vadd.f32 %v1141_v28, %v1140_v23  ;;  %v1055_v23 = vmul.f32 %v1991_v40, %v1991_v40  ;;  %v1056_v28 = vmul.f32 %v1964_v20, %v1964_v20 }
 0x15f   : > { %v960_v30 = vsel %vm814_vm0, %v1991_v40, 0.0  ;;  %v1058_v40 = vmul.f32 %v2009_v60, %v2009_v60 }
 0x160   : > { %v947_v39 = vadd.f32 %v946_v35, %v945_v31  ;;  %v1144_v42 = vadd.f32 %v1143_v38, %v1142_v33  ;;  %v962_v35 = vsel %vm814_vm0, %v1964_v20, 0.0  ;;  %v1159_v43 = vsel %vm814_vm0, %v1055_v23, 0.0 }
 0x161   : > { %v966_v20 = vsel %vm814_vm0, %v2009_v60, 0.0  ;;  %v1061_v60 = vmul.f32 %v2018_v4, %v2018_v4  ;;  %v978_v23 = vsel %vm814_vm0, %v2036_v21, 0.0 }
 0x162   : > { %v1146_v51 = vadd.f32 %v1145_v46, %v1144_v42  ;;  %v949_v53 = vadd.f32 %v948_v49, %v947_v39  ;;  %v1161_v42 = vsel %vm814_vm0, %v1056_v28, 0.0  ;;  %v964_v46 = vsel %vm814_vm0, %v1982_v34, 0.0 }
 0x163   : > { %v1165_v34 = vsel %vm814_vm0, %v1058_v40, 0.0 }
 0x164   : > { %v951_v59 = vadd.f32 %v950_v41, %v949_v53  ;;  %v1148_v61 = vadd.f32 %v1147_v54, %v1146_v51  ;;  %v1163_v51 = vsel %vm814_vm0, %v1057_v27, 0.0  ;;  %v1059_v53 = vmul.f32 %v2027_v11, %v2027_v11 }
 0x165   : > { %v1067_v27 = vmul.f32 %v2099_v22, %v2099_v22 }
 0x166   : > { %v1150_v2 = vadd.f32 %v1149_v45, %v1148_v61  ;;  %v953_v5 = vadd.f32 %v952_v0, %v951_v59  ;;  %v968_v59 = vsel %vm814_vm0, %v2027_v11, 0.0  ;;  %v970_v45 = vsel %vm814_vm0, %v2000_v52, 0.0 }
 0x167   : > { %v1167_v0 = vsel %vm814_vm0, %v1059_v53, 0.0  ;;  %v1062_v11 = vmul.f32 %v2045_v29, %v2045_v29  ;;  %v974_v52 = vsel %vm814_vm0, %v2045_v29, 0.0  ;;  %v1065_v29 = vmul.f32 %v2054_v37, %v2054_v37 }
 0x168   : > { %v955_v9 = vadd.f32 %v954_v7, %v953_v5  ;;  %v1152_v10 = vadd.f32 %v1151_v8, %v1150_v2  ;;  %v1169_v7 = vsel %vm814_vm0, %v1060_v57, 0.0 }
 0x169   : > { %v1173_v4 = vsel %vm814_vm0, %v1062_v11, 0.0 }
 0x16a   : > { %v1154_v18 = vadd.f32 %v1153_v16, %v1152_v10  ;;  %v957_v19 = vadd.f32 %v956_v17, %v955_v9  ;;  %v1171_v10 = vsel %vm814_vm0, %v1061_v60, 0.0  ;;  %v1063_v16 = vmul.f32 %v2063_v47, %v2063_v47 }
 0x16b   : > { %v992_v60 = vsel %vm814_vm0, %v2135_v1, 0.0 }
 0x16c   : > { %v959_v24 = vadd.f32 %v958_v55, %v957_v19  ;;  %v1156_v26 = vadd.f32 %v1155_v13, %v1154_v18  ;;  %v1064_v18 = vmul.f32 %v2036_v21, %v2036_v21  ;;  %v976_v19 = vsel %vm814_vm0, %v2063_v47, 0.0 }
 0x16d   : > { %v1066_v47 = vmul.f32 %v2081_v3, %v2081_v3  ;;  %v982_v21 = vsel %vm814_vm0, %v2081_v3, 0.0  ;;  %v1069_v3 = vmul.f32 %v2090_v14, %v2090_v14 }
 0x16e   : > { %v1158_v31 = vadd.f32 %v1157_v6, %v1156_v26  ;;  %v961_v33 = vadd.f32 %v960_v30, %v959_v24  ;;  %v1175_v24 = vsel %vm814_vm0, %v1063_v16, 0.0  ;;  %v1177_v6 = vsel %vm814_vm0, %v1064_v18, 0.0 }
 0x16f   : > { %v980_v30 = vsel %vm814_vm0, %v2054_v37, 0.0  ;;  %v1181_v37 = vsel %vm814_vm0, %v1066_v47, 0.0 }
 0x170   : > { %v963_v38 = vadd.f32 %v962_v35, %v961_v33  ;;  %v1160_v39 = vadd.f32 %v1159_v43, %v1158_v31  ;;  %v1179_v35 = vsel %vm814_vm0, %v1065_v29, 0.0 }
 0x172   : > { %v1162_v49 = vadd.f32 %v1161_v42, %v1160_v39  ;;  %v965_v48 = vadd.f32 %v964_v46, %v963_v38  ;;  %v1068_v39 = vmul.f32 %v2072_v58, %v2072_v58  ;;  %v984_v42 = vsel %vm814_vm0, %v2099_v22, 0.0 }
 0x173   : > { %v1070_v22 = vmul.f32 %v2117_v44, %v2117_v44 }
 0x174   : > { %v967_v54 = vadd.f32 %v966_v20, %v965_v48  ;;  %v1164_v41 = vadd.f32 %v1163_v51, %v1162_v49  ;;  %v986_v49 = vsel %vm814_vm0, %v2072_v58, 0.0  ;;  %v1183_v48 = vsel %vm814_vm0, %v1067_v27, 0.0 }
 0x175   : > { %v1185_v53 = vsel %vm814_vm0, %v1068_v39, 0.0  ;;  %v990_v58 = vsel %vm814_vm0, %v2117_v44, 0.0  ;;  %v1073_v44 = vmul.f32 %v2126_v56, %v2126_v56 }
 0x176   : > { %v1166_v61 = vadd.f32 %v1165_v34, %v1164_v41  ;;  %v969_v62 = vadd.f32 %v968_v59, %v967_v54  ;;  %v988_v54 = vsel %vm814_vm0, %v2090_v14, 0.0  ;;  %v1187_v34 = vsel %vm814_vm0, %v1069_v3, 0.0 }
 0x177   : > { %v1071_v59 = vmul.f32 %v2135_v1, %v2135_v1  ;;  %v1189_v14 = vsel %vm814_vm0, %v1070_v22, 0.0  ;;  %v1074_v1 = vmul.f32 %v2153_v25, %v2153_v25  ;;  %v1195_v16 = vsel %vm814_vm0, %v1073_v44, 0.0 }
 0x178   : > { %v971_v2 = vadd.f32 %v970_v45, %v969_v62  ;;  %v1168_v5 = vadd.f32 %v1167_v0, %v1166_v61  ;;  %v1072_v45 = vmul.f32 %v2108_v32, %v2108_v32 }
 0x17a   : > { %v1170_v8 = vadd.f32 %v1169_v7, %v1168_v5  ;;  %v973_v9 = vadd.f32 %v972_v63, %v971_v2  ;;  %v994_v5 = vsel %vm814_vm0, %v2108_v32, 0.0  ;;  %v1191_v7 = vsel %vm814_vm0, %v1071_v59, 0.0 }
 0x17b   : > { %v998_v32 = vsel %vm814_vm0, %v2153_v25, 0.0  ;;  %v1077_v25 = vmul.f32 %v2162_v36, %v2162_v36 }
 0x17c   : > { %v975_v17 = vadd.f32 %v974_v52, %v973_v9  ;;  %v1172_v12 = vadd.f32 %v1171_v10, %v1170_v8  ;;  %v1193_v8 = vsel %vm814_vm0, %v1072_v45, 0.0  ;;  %v996_v9 = vsel %vm814_vm0, %v2126_v56, 0.0 }
 0x17d   : > { %v1197_v56 = vsel %vm814_vm0, %v1074_v1, 0.0  ;;  %v1203_v47 = vsel %vm814_vm0, %v1077_v25, 0.0 }
 0x17e   : > { %v1174_v13 = vadd.f32 %v1173_v4, %v1172_v12  ;;  %v977_v55 = vadd.f32 %v976_v19, %v975_v17  ;;  %v1075_v17 = vmul.f32 %v2171_v50, %v2171_v50  ;;  %v1076_v4 = vmul.f32 %v2144_v15, %v2144_v15 }
 0x17f   : > { %v1000_v19 = vsel %vm814_vm0, %v2171_v50, 0.0 }
 0x180   : > { %v979_v26 = vadd.f32 %v978_v23, %v977_v55  ;;  %v1176_v28 = vadd.f32 %v1175_v24, %v1174_v13  ;;  %v1002_v23 = vsel %vm814_vm0, %v2144_v15, 0.0  ;;  %v1199_v29 = vsel %vm814_vm0, %v1075_v17, 0.0 }
 0x182   : > { %v1178_v31 = vadd.f32 %v1177_v6, %v1176_v28  ;;  %v981_v33 = vadd.f32 %v980_v30, %v979_v26  ;;  %v1201_v28 = vsel %vm814_vm0, %v1076_v4, 0.0  ;;  %v1004_v6 = vsel %vm814_vm0, %v2162_v36, 0.0 }
 0x184   : > { %v983_v43 = vadd.f32 %v982_v21, %v981_v33  ;;  %v1180_v38 = vadd.f32 %v1179_v35, %v1178_v31 }
 0x186   : > { %v1182_v46 = vadd.f32 %v1181_v37, %v1180_v38  ;;  %v985_v40 = vadd.f32 %v984_v42, %v983_v43 }
 0x188   : > { %v987_v51 = vadd.f32 %v986_v49, %v985_v40  ;;  %v1184_v20 = vadd.f32 %v1183_v48, %v1182_v46 }
 0x18a   : > { %v1186_v41 = vadd.f32 %v1185_v53, %v1184_v20  ;;  %v989_v57 = vadd.f32 %v988_v54, %v987_v51 }
 0x18c   : > { %v991_v61 = vadd.f32 %v990_v58, %v989_v57  ;;  %v1188_v62 = vadd.f32 %v1187_v34, %v1186_v41 }
 0x18e   : > { %v1190_v0 = vadd.f32 %v1189_v14, %v1188_v62  ;;  %v993_v2 = vadd.f32 %v992_v60, %v991_v61 }
 0x190   : > { %v995_v63 = vadd.f32 %v994_v5, %v993_v2  ;;  %v1192_v11 = vadd.f32 %v1191_v7, %v1190_v0 }
 0x192   : > { %v1194_v10 = vadd.f32 %v1193_v8, %v1192_v11  ;;  %v997_v52 = vadd.f32 %v996_v9, %v995_v63 }
 0x194   : > { %v999_v12 = vadd.f32 %v998_v32, %v997_v52  ;;  %v1196_v18 = vadd.f32 %v1195_v16, %v1194_v10 }
 0x196   : > { %v1198_v13 = vadd.f32 %v1197_v56, %v1196_v18  ;;  %v1001_v55 = vadd.f32 %v1000_v19, %v999_v12 }
 0x198   : > { %v1003_v24 = vadd.f32 %v1002_v23, %v1001_v55  ;;  %v1200_v26 = vadd.f32 %v1199_v29, %v1198_v13 }
 0x19a   : > { %v1005_v50 = vadd.f32 %v1004_v6, %v1003_v24  ;;  %v1202_v30 = vadd.f32 %v1201_v28, %v1200_v26 }
 0x19c   : > { %v1006_v31 = vrot.slane %v1005_v50, 4  ;;  %v1204_v33 = vadd.f32 %v1203_v47, %v1202_v30 }
 0x19e   : > { %v1007_v15 = vadd.f32 %v1006_v31, %v1005_v50  ;;  %v1205_v35 = vrot.slane %v1204_v33, 4 }
 0x1a0   : > { %v1008_v21 = vrot.slane %v1007_v15, 2  ;;  %v1206_v27 = vadd.f32 %v1205_v35, %v1204_v33 }
 0x1a2   : > { %v1009_v43 = vadd.f32 %v1008_v21, %v1007_v15  ;;  %v1207_v38 = vrot.slane %v1206_v27, 2 }
 0x1a4   : > { %v1010_v39 = vrot.slane %v1009_v43, 1  ;;  %v1208_v37 = vadd.f32 %v1207_v38, %v1206_v27 }
 0x1a6   : > { %v1011_v36 = vadd.f32 %v1010_v39, %v1009_v43  ;;  %v1209_v42 = vrot.slane %v1208_v37, 1 }
 0x1a8   : > { %v1210_v46 = vadd.f32 %v1209_v42, %v1208_v37  ;;  %1013 = vst.msk [vmem:[%s196_s23] sm:$0x1] %vm1012_vm1, %v1011_v36 }
 0x1aa   : > { %1211 = vst.msk [vmem:[%s196_s23 + $0x1] sm:$0x1] %vm1012_vm1, %v1210_v46 }
 0x1ab   : > { %1651 = shalt.err (!%p1648_p0)
}
 0x1ac   : > { %s1652_s10 = scalar_lea.hbm %s1233_s27, 32  ;;  %s1656_s6 = scalar_lea.hbm %s2384_s3, 64 }
 0x1ad   : > { %p1653_p2 = scmp.ne.s32.totalorder %s1233_s27, %s1652_s10  ;;  %p1657_p3 = scmp.lt.s32.totalorder %s1233_s27, %s2384_s3 }
 0x1ae   : > { %p1658_p6 = scmp.lt.s32.totalorder %s1656_s6, %s1652_s10 }
 0x1af   : > { %p1654_p9 = pnand %p1653_p2, %p2393_p13 }
 0x1b0   : > { %p1659_p11 = por %p1658_p6, %p1657_p3 }
 0x1b1   : > { %p1655_p1 = pneg %p1654_p9 }
 0x1b3   : > { %p1660_p12 = pnand %p1659_p11, %p1655_p1 }
 0x1b5   : > { %1663 = shalt.err (!%p1660_p12)
}
 0x1b6   : > { %1524 = dma.vmem_to_hbm [thread:$0]  (%p2393_p13), %s1236_s20, 32, %s1233_s27, %s1218_s28  }
 0x1b7 PF: > { %s1255_s17 = sand.u32 1, %s1690_s12   ;;  %p2394_p4 = scmp.ne.s32.totalorder %s2390_s25, 0 }
 0x1b8   : > { %p2395_p5 = scmp.ge.s32.totalorder %s1702_s15, 2  ;;  %s1256_s11 = scalar_lea.sflag [#allocation4], %s1255_s17 }
 0x1ba   : > { %p1531_p7 = pnand %p2395_p5, %p2394_p4 }
 0x1bc   : > { %p1532_p8 = pneg %p1531_p7 }
 0x1be   : > { %1685 = dma.done.wait (%p1532_p8), %s1256_s11, 32  }
 0x1bf   : > { %1687 = vsyncadd (%p1532_p8), %s1256_s11, 4294967264  ;;  %p17_p10 = scmp.ge.s32.totalorder %s1753_s18, 4   ;;  %s2396_s12 = smov %s1694_s13 }
 0x1c0   : > { %s2397_s13 = smov %s1698_s14  ;;  %s2398_s14 = smov %s1765_s21 }
 0x1c1   : > { %s2399_s15 = smov %s1753_s18  ;;  %19 = sbr.rel (!%p17_p10) target bundleno = 5 (0x5), region = 85 }
 0x1c6   :  { %1261 = vsyncpa [#allocation3], 1 }
 0x1c7   :  { %1263 = vsyncpa [#allocation3 + $0x1], 1 }
 0x1c8   :  { %1264 = vsyncpa [#allocation4], 1 }
 0x1c9   :  { %1266 = vsyncpa [#allocation4 + $0x1], 1 }

</bundles_post_ra>
